<compile_context>
chip_gen: v6e
topology: v6e:2x2x1
jax: 0.10.0
libtpu: 0.0.40
codegen_flags: <defaults>
</compile_context>

<pallas_src>
import functools
import string

import jax
import jax.numpy as jnp
from jax import lax
from jax.experimental import pallas as pl
from jax.experimental.pallas import tpu as pltpu

BATCH_TILE = 8          # sublane-aligned batch tile
LANE = 128              # lane width; classifier logits are padded to a multiple of this
NEG_INF = -1e30         # bias for unused (padded) logit lanes


def _round_up(x, m):
    return (x + m - 1) // m * m


def rnn_seq_kernel(x_ref, h0_ref, whh_ref, b_ref, wlin_ref, blin_ref,
                   logp_ref, hn_ref, h_all):
    """One batch-tile grid point; the full sequence is processed in-kernel.

    x_ref    : (T, BT, H)     f32   embedded letters (rows of W_ih^T)
    h0_ref   : (BT, H)        f32   initial hidden state
    whh_ref  : (H, H)         bf16  W_hh^T                      (resident)
    b_ref    : (1, H)         f32   b_ih + b_hh (fused)         (resident)
    wlin_ref : (H, O_pad)     bf16  W_lin^T, lane-padded        (resident)
    blin_ref : (1, O_pad)     f32   b_lin, padded lanes = -1e30 (resident)
    logp_ref : (T, BT, O_pad) f32   per-step log-softmax output
    hn_ref   : (BT, H)        f32   final hidden state
    h_all    : (T*BT, H)      f32   VMEM stash of all per-step hidden states
    """
    T, BT, _ = x_ref.shape
    O_pad = blin_ref.shape[1]

    # hoist resident weights/bias out of the recurrence loop
    whh = whh_ref[...]
    b = b_ref[...]

    def step(t, h):
        x = x_ref[t]                                              # (BT, H) f32
        # h_new = tanh(x_emb + h @ W_hh^T + (b_ih + b_hh))        (bf16 MXU, f32 acc)
        z = (x
             + jnp.dot(h.astype(jnp.bfloat16), whh,
                       preferred_element_type=jnp.float32)
             + b)
        h_new = jnp.tanh(z)
        off = pl.multiple_of(t * BT, BT)
        h_all[pl.ds(off, BT), :] = h_new
        return h_new

    h_final = lax.fori_loop(0, T, step, h0_ref[...], unroll=True)
    hn_ref[...] = h_final

    # classifier + log-softmax over ALL timesteps at once (one big MXU matmul).
    # Padded logit lanes carry -1e30 bias so they contribute nothing to the
    # normalizer.
    hs = h_all[...]                                               # (T*BT, H)
    logits = (jnp.dot(hs.astype(jnp.bfloat16), wlin_ref[...],
                      preferred_element_type=jnp.float32)
              + blin_ref[...])                                    # (T*BT, O_pad)
    m = jnp.max(logits, axis=-1, keepdims=True)
    lse = jnp.log(jnp.sum(jnp.exp(logits - m), axis=-1, keepdims=True)) + m
    logp_ref[...] = (logits - lse).reshape(T, BT, O_pad)


@functools.partial(jax.jit, static_argnames=("n_categories",))
def rnn_forward_sequences(letter_idx, h0, params, *, n_categories):
    """letter_idx: (B, T) int32 letter indices; h0: (B, H) f32.
    Returns (log_probs (B, T, n_categories) f32, hn (B, H) f32)."""
    B, T = letter_idx.shape
    H = params["w_hh_t"].shape[0]
    O_pad = params["w_lin_t"].shape[1]
    assert H % LANE == 0, "hidden size must be a multiple of 128"

    Bp = _round_up(max(B, 1), BATCH_TILE)
    if Bp != B:
        letter_idx = jnp.pad(letter_idx, ((0, Bp - B), (0, 0)))
        h0 = jnp.pad(h0, ((0, Bp - B), (0, 0)))

    # one-hot @ W_ih^T == row gather of W_ih^T: embed the whole batch/sequence
    # with a single XLA gather, laid out (T, Bp, H) so each batch tile streams
    # sublane/lane-aligned (BT, H) slabs per step.
    x_emb = jnp.take(params["w_ih_t"], letter_idx, axis=0).astype(jnp.float32)
    x_emb = jnp.transpose(x_emb, (1, 0, 2))                     # (T, Bp, H)

    grid = (Bp // BATCH_TILE,)
    logp_pad, hn = pl.pallas_call(
        rnn_seq_kernel,
        out_shape=(jax.ShapeDtypeStruct((T, Bp, O_pad), jnp.float32),
                   jax.ShapeDtypeStruct((Bp, H), jnp.float32)),
        grid_spec=pltpu.PrefetchScalarGridSpec(
            num_scalar_prefetch=0,
            grid=grid,
            in_specs=[
                pl.BlockSpec((T, BATCH_TILE, H), lambda b: (0, b, 0)),   # x_emb
                pl.BlockSpec((BATCH_TILE, H), lambda b: (b, 0)),         # h0
                pl.BlockSpec((H, H), lambda b: (0, 0)),                  # W_hh^T (resident)
                pl.BlockSpec((1, H), lambda b: (0, 0)),                  # fused bias
                pl.BlockSpec((H, O_pad), lambda b: (0, 0)),              # W_lin^T (resident)
                pl.BlockSpec((1, O_pad), lambda b: (0, 0)),              # b_lin padded
            ],
            out_specs=(
                pl.BlockSpec((T, BATCH_TILE, O_pad), lambda b: (0, b, 0)),
                pl.BlockSpec((BATCH_TILE, H), lambda b: (b, 0)),
            ),
            scratch_shapes=[pltpu.VMEM((T * BATCH_TILE, H), jnp.float32)],
        ),
        compiler_params=pltpu.CompilerParams(
            dimension_semantics=("parallel",)),
    )(x_emb, h0, params["w_hh_t"], params["b"],
      params["w_lin_t"], params["b_lin"])

    logp = jnp.transpose(logp_pad, (1, 0, 2))[:B, :, :n_categories]
    return logp, hn[:B]


def rnn_forward(x, hidden, params, *, n_categories):
    """Matches the PyTorch module forward exactly:
    x (1, n_letters) one-hot, hidden (1, 1, H)
    -> (log_probs (1, 1, n_categories), hn (1, 1, H))."""
    H = params["w_hh_t"].shape[0]
    # lineToTensor produces exact one-hots, so argmax recovers the letter index.
    idx = jnp.argmax(x, axis=-1).astype(jnp.int32).reshape(1, 1)
    h0 = hidden.reshape(1, H).astype(jnp.float32)
    logp, hn = rnn_forward_sequences(idx, h0, params, n_categories=n_categories)
    return logp.reshape(1, 1, n_categories), hn.reshape(1, 1, H)


def init_params(key, input_size, hidden_size, output_size):
    """nn.RNN / nn.Linear-style init, pre-transposed, pre-fused and lane-padded."""
    ks = jax.random.split(key, 6)
    bound = 1.0 / jnp.sqrt(hidden_size)
    u = lambda k, shape: jax.random.uniform(k, shape, jnp.float32, -bound, bound)
    w_ih = u(ks[0], (hidden_size, input_size))
    w_hh = u(ks[1], (hidden_size, hidden_size))
    b_ih = u(ks[2], (hidden_size,))
    b_hh = u(ks[3], (hidden_size,))
    w_lin = u(ks[4], (output_size, hidden_size))
    b_lin = u(ks[5], (output_size,))

    o_pad = _round_up(max(output_size, 1), LANE)
    w_lin_t = jnp.zeros((hidden_size, o_pad), jnp.float32).at[:, :output_size].set(w_lin.T)
    b_lin_p = jnp.full((1, o_pad), NEG_INF, jnp.float32).at[0, :output_size].set(b_lin)

    return {
        "w_ih_t": w_ih.T.astype(jnp.bfloat16),        # (I, H)  letter-embedding table
        "w_hh_t": w_hh.T.astype(jnp.bfloat16),        # (H, H)
        "b": (b_ih + b_hh).reshape(1, -1),            # (1, H)  fused f32 bias
        "w_lin_t": w_lin_t.astype(jnp.bfloat16),      # (H, O_pad)
        "b_lin": b_lin_p,                             # (1, O_pad) f32, padded lanes -1e30
    }


def rnn_reference(letter_idx, h0, params, n_categories):
    """Pure-JAX reference with the same bf16-weight / f32-accumulate math."""
    x_emb = jnp.take(params["w_ih_t"], letter_idx, axis=0).astype(jnp.float32)  # (B,T,H)

    def step(h, x_t):
        z = (x_t
             + jnp.dot(h.astype(jnp.bfloat16), params["w_hh_t"],
                       preferred_element_type=jnp.float32)
             + params["b"])
        h_new = jnp.tanh(z)
        logits = (jnp.dot(h_new.astype(jnp.bfloat16), params["w_lin_t"],
                          preferred_element_type=jnp.float32)
                  + params["b_lin"])
        return h_new, jax.nn.log_softmax(logits, axis=-1)

    hn, logps = jax.lax.scan(step, h0, jnp.transpose(x_emb, (1, 0, 2)))
    return jnp.transpose(logps, (1, 0, 2))[:, :, :n_categories], hn


if __name__ == "__main__":
    all_letters = string.ascii_letters + " .,;'"
    n_letters = len(all_letters)        # 57
    n_hidden = 128
    n_categories = 18                   # all_categories is empty in the source; use a small nonzero size

    key = jax.random.PRNGKey(0)
    pkey, dkey = jax.random.split(key)
    params = init_params(pkey, n_letters, n_hidden, n_categories)

    # ---- batched whole-sequence path: 16 names x 8 characters in ONE kernel call ----
    B, T = 16, 8
    letter_idx = jax.random.randint(dkey, (B, T), 0, n_letters, dtype=jnp.int32)
    h0 = jnp.zeros((B, n_hidden), jnp.float32)

    logp, hn = rnn_forward_sequences(letter_idx, h0, params, n_categories=n_categories)
    jax.block_until_ready((logp, hn))
    assert logp.shape == (B, T, n_categories)
    assert hn.shape == (B, n_hidden)

    logp_ref, hn_ref = rnn_reference(letter_idx, h0, params, n_categories)
    assert jnp.allclose(logp, logp_ref, atol=5e-3, rtol=5e-3), \
        float(jnp.max(jnp.abs(logp - logp_ref)))
    assert jnp.allclose(hn, hn_ref, atol=5e-3, rtol=5e-3), \
        float(jnp.max(jnp.abs(hn - hn_ref)))
    assert jnp.allclose(jnp.sum(jnp.exp(logp), axis=-1), 1.0, atol=1e-3)

    # ---- single-step path matching the PyTorch module forward (letter 'b') ----
    x = jnp.zeros((1, n_letters), jnp.float32).at[0, all_letters.find('b')].set(1.0)
    hidden = jnp.zeros((1, 1, n_hidden), jnp.float32)   # initHidden()
    step_logp, step_hn = rnn_forward(x, hidden, params, n_categories=n_categories)
    jax.block_until_ready((step_logp, step_hn))
    assert step_logp.shape == (1, 1, n_categories)
    assert step_hn.shape == (1, 1, n_hidden)
    assert jnp.allclose(jnp.sum(jnp.exp(step_logp)), 1.0, atol=1e-3)

    print("KERNEL_OK")
</pallas_src>

<mosaic_0001>
module attributes {stable_mosaic.version = 11 : i64} {
  func.func @rnn_seq_kernel(%arg0: i32, %arg1: memref<8x8x128xf32, #tpu.memory_space<vmem>>, %arg2: memref<8x128xf32, #tpu.memory_space<vmem>>, %arg3: memref<128x128xbf16, #tpu.memory_space<vmem>>, %arg4: memref<1x128xf32, #tpu.memory_space<vmem>>, %arg5: memref<128x128xbf16, #tpu.memory_space<vmem>>, %arg6: memref<1x128xf32, #tpu.memory_space<vmem>>, %arg7: memref<8x8x128xf32, #tpu.memory_space<vmem>>, %arg8: memref<8x128xf32, #tpu.memory_space<vmem>>, %arg9: memref<64x128xf32, #tpu.memory_space<vmem>>) attributes {dimension_semantics = [#tpu.dimension_semantics<parallel>], iteration_bounds = array<i64: 2>, scalar_prefetch = 0 : i64, scratch_operands = 1 : i64, tpu.core_type = #tpu.core_type<tc>, window_params = [{transform_indices = @transform_0, window_bounds = array<i64: 8, 8, 128>}, {transform_indices = @transform_1, window_bounds = array<i64: 8, 128>}, {pipeline_mode = #tpu.pipeline_mode<synchronous>, transform_indices = @transform_2, window_bounds = array<i64: 128, 128>}, {pipeline_mode = #tpu.pipeline_mode<synchronous>, transform_indices = @transform_3, window_bounds = array<i64: 1, 128>}, {pipeline_mode = #tpu.pipeline_mode<synchronous>, transform_indices = @transform_4, window_bounds = array<i64: 128, 128>}, {pipeline_mode = #tpu.pipeline_mode<synchronous>, transform_indices = @transform_5, window_bounds = array<i64: 1, 128>}, {transform_indices = @transform_6, window_bounds = array<i64: 8, 8, 128>}, {transform_indices = @transform_7, window_bounds = array<i64: 8, 128>}]} {
    %c0 = arith.constant 0 : index
    %c0_0 = arith.constant 0 : index
    %0 = vector.load %arg3[%c0, %c0_0] : memref<128x128xbf16, #tpu.memory_space<vmem>>, vector<128x128xbf16>
    %c0_1 = arith.constant 0 : index
    %c0_2 = arith.constant 0 : index
    %1 = vector.load %arg4[%c0_1, %c0_2] : memref<1x128xf32, #tpu.memory_space<vmem>>, vector<1x128xf32>
    %c0_3 = arith.constant 0 : index
    %c0_4 = arith.constant 0 : index
    %2 = vector.load %arg2[%c0_3, %c0_4] : memref<8x128xf32, #tpu.memory_space<vmem>>, vector<8x128xf32>
    %c0_i32 = arith.constant 0 : i32
    %3 = arith.index_cast %c0_i32 : i32 to index
    %c0_5 = arith.constant 0 : index
    %c0_6 = arith.constant 0 : index
    %4 = vector.load %arg1[%3, %c0_5, %c0_6] : memref<8x8x128xf32, #tpu.memory_space<vmem>>, vector<1x8x128xf32>
    %5 = vector.shape_cast %4 : vector<1x8x128xf32> to vector<8x128xf32>
    %6 = arith.truncf %2 : vector<8x128xf32> to vector<8x128xbf16>
    %cst = arith.constant dense<0.000000e+00> : vector<8x128xf32>
    %7 = tpu.matmul %6, %0, %cst {dimension_numbers = #tpu.dot_dimension_numbers<[1], [0], [0], [1], [0, 0, 1, 1], [], []>} : vector<8x128xbf16>, vector<128x128xbf16>, vector<8x128xf32> -> vector<8x128xf32>
    %8 = arith.addf %5, %7 : vector<8x128xf32>
    %9 = vector.broadcast %1 : vector<1x128xf32> to vector<8x128xf32>
    %10 = arith.addf %8, %9 : vector<8x128xf32>
    %11 = math.tanh %10 : vector<8x128xf32>
    %c8_i32 = arith.constant 8 : i32
    %12 = arith.muli %c0_i32, %c8_i32 : i32
    %13 = tpu.assume_multiple %12, 8 : i32
    %14 = arith.index_cast %13 : i32 to index
    %c0_7 = arith.constant 0 : index
    %15 = vector.load %arg9[%14, %c0_7] : memref<64x128xf32, #tpu.memory_space<vmem>>, vector<8x128xf32>
    tpu.vector_store %arg9[%14, %c0_7], %11 {strides = array<i32>} : memref<64x128xf32, #tpu.memory_space<vmem>>, vector<8x128xf32>,
    %c1_i32 = arith.constant 1 : i32
    %16 = arith.index_cast %c1_i32 : i32 to index
    %c0_8 = arith.constant 0 : index
    %c0_9 = arith.constant 0 : index
    %17 = vector.load %arg1[%16, %c0_8, %c0_9] : memref<8x8x128xf32, #tpu.memory_space<vmem>>, vector<1x8x128xf32>
    %18 = vector.shape_cast %17 : vector<1x8x128xf32> to vector<8x128xf32>
    %19 = arith.truncf %11 : vector<8x128xf32> to vector<8x128xbf16>
    %cst_10 = arith.constant dense<0.000000e+00> : vector<8x128xf32>
    %20 = tpu.matmul %19, %0, %cst_10 {dimension_numbers = #tpu.dot_dimension_numbers<[1], [0], [0], [1], [0, 0, 1, 1], [], []>} : vector<8x128xbf16>, vector<128x128xbf16>, vector<8x128xf32> -> vector<8x128xf32>
    %21 = arith.addf %18, %20 : vector<8x128xf32>
    %22 = vector.broadcast %1 : vector<1x128xf32> to vector<8x128xf32>
    %23 = arith.addf %21, %22 : vector<8x128xf32>
    %24 = math.tanh %23 : vector<8x128xf32>
    %c8_i32_11 = arith.constant 8 : i32
    %25 = arith.muli %c1_i32, %c8_i32_11 : i32
    %26 = tpu.assume_multiple %25, 8 : i32
    %27 = arith.index_cast %26 : i32 to index
    %c0_12 = arith.constant 0 : index
    %28 = vector.load %arg9[%27, %c0_12] : memref<64x128xf32, #tpu.memory_space<vmem>>, vector<8x128xf32>
    tpu.vector_store %arg9[%27, %c0_12], %24 {strides = array<i32>} : memref<64x128xf32, #tpu.memory_space<vmem>>, vector<8x128xf32>,
    %c2_i32 = arith.constant 2 : i32
    %29 = arith.index_cast %c2_i32 : i32 to index
    %c0_13 = arith.constant 0 : index
    %c0_14 = arith.constant 0 : index
    %30 = vector.load %arg1[%29, %c0_13, %c0_14] : memref<8x8x128xf32, #tpu.memory_space<vmem>>, vector<1x8x128xf32>
    %31 = vector.shape_cast %30 : vector<1x8x128xf32> to vector<8x128xf32>
    %32 = arith.truncf %24 : vector<8x128xf32> to vector<8x128xbf16>
    %cst_15 = arith.constant dense<0.000000e+00> : vector<8x128xf32>
    %33 = tpu.matmul %32, %0, %cst_15 {dimension_numbers = #tpu.dot_dimension_numbers<[1], [0], [0], [1], [0, 0, 1, 1], [], []>} : vector<8x128xbf16>, vector<128x128xbf16>, vector<8x128xf32> -> vector<8x128xf32>
    %34 = arith.addf %31, %33 : vector<8x128xf32>
    %35 = vector.broadcast %1 : vector<1x128xf32> to vector<8x128xf32>
    %36 = arith.addf %34, %35 : vector<8x128xf32>
    %37 = math.tanh %36 : vector<8x128xf32>
    %c8_i32_16 = arith.constant 8 : i32
    %38 = arith.muli %c2_i32, %c8_i32_16 : i32
    %39 = tpu.assume_multiple %38, 8 : i32
    %40 = arith.index_cast %39 : i32 to index
    %c0_17 = arith.constant 0 : index
    %41 = vector.load %arg9[%40, %c0_17] : memref<64x128xf32, #tpu.memory_space<vmem>>, vector<8x128xf32>
    tpu.vector_store %arg9[%40, %c0_17], %37 {strides = array<i32>} : memref<64x128xf32, #tpu.memory_space<vmem>>, vector<8x128xf32>,
    %c3_i32 = arith.constant 3 : i32
    %42 = arith.index_cast %c3_i32 : i32 to index
    %c0_18 = arith.constant 0 : index
    %c0_19 = arith.constant 0 : index
    %43 = vector.load %arg1[%42, %c0_18, %c0_19] : memref<8x8x128xf32, #tpu.memory_space<vmem>>, vector<1x8x128xf32>
    %44 = vector.shape_cast %43 : vector<1x8x128xf32> to vector<8x128xf32>
    %45 = arith.truncf %37 : vector<8x128xf32> to vector<8x128xbf16>
    %cst_20 = arith.constant dense<0.000000e+00> : vector<8x128xf32>
    %46 = tpu.matmul %45, %0, %cst_20 {dimension_numbers = #tpu.dot_dimension_numbers<[1], [0], [0], [1], [0, 0, 1, 1], [], []>} : vector<8x128xbf16>, vector<128x128xbf16>, vector<8x128xf32> -> vector<8x128xf32>
    %47 = arith.addf %44, %46 : vector<8x128xf32>
    %48 = vector.broadcast %1 : vector<1x128xf32> to vector<8x128xf32>
    %49 = arith.addf %47, %48 : vector<8x128xf32>
    %50 = math.tanh %49 : vector<8x128xf32>
    %c8_i32_21 = arith.constant 8 : i32
    %51 = arith.muli %c3_i32, %c8_i32_21 : i32
    %52 = tpu.assume_multiple %51, 8 : i32
    %53 = arith.index_cast %52 : i32 to index
    %c0_22 = arith.constant 0 : index
    %54 = vector.load %arg9[%53, %c0_22] : memref<64x128xf32, #tpu.memory_space<vmem>>, vector<8x128xf32>
    tpu.vector_store %arg9[%53, %c0_22], %50 {strides = array<i32>} : memref<64x128xf32, #tpu.memory_space<vmem>>, vector<8x128xf32>,
    %c4_i32 = arith.constant 4 : i32
    %55 = arith.index_cast %c4_i32 : i32 to index
    %c0_23 = arith.constant 0 : index
    %c0_24 = arith.constant 0 : index
    %56 = vector.load %arg1[%55, %c0_23, %c0_24] : memref<8x8x128xf32, #tpu.memory_space<vmem>>, vector<1x8x128xf32>
    %57 = vector.shape_cast %56 : vector<1x8x128xf32> to vector<8x128xf32>
    %58 = arith.truncf %50 : vector<8x128xf32> to vector<8x128xbf16>
    %cst_25 = arith.constant dense<0.000000e+00> : vector<8x128xf32>
    %59 = tpu.matmul %58, %0, %cst_25 {dimension_numbers = #tpu.dot_dimension_numbers<[1], [0], [0], [1], [0, 0, 1, 1], [], []>} : vector<8x128xbf16>, vector<128x128xbf16>, vector<8x128xf32> -> vector<8x128xf32>
    %60 = arith.addf %57, %59 : vector<8x128xf32>
    %61 = vector.broadcast %1 : vector<1x128xf32> to vector<8x128xf32>
    %62 = arith.addf %60, %61 : vector<8x128xf32>
    %63 = math.tanh %62 : vector<8x128xf32>
    %c8_i32_26 = arith.constant 8 : i32
    %64 = arith.muli %c4_i32, %c8_i32_26 : i32
    %65 = tpu.assume_multiple %64, 8 : i32
    %66 = arith.index_cast %65 : i32 to index
    %c0_27 = arith.constant 0 : index
    %67 = vector.load %arg9[%66, %c0_27] : memref<64x128xf32, #tpu.memory_space<vmem>>, vector<8x128xf32>
    tpu.vector_store %arg9[%66, %c0_27], %63 {strides = array<i32>} : memref<64x128xf32, #tpu.memory_space<vmem>>, vector<8x128xf32>,
    %c5_i32 = arith.constant 5 : i32
    %68 = arith.index_cast %c5_i32 : i32 to index
    %c0_28 = arith.constant 0 : index
    %c0_29 = arith.constant 0 : index
    %69 = vector.load %arg1[%68, %c0_28, %c0_29] : memref<8x8x128xf32, #tpu.memory_space<vmem>>, vector<1x8x128xf32>
    %70 = vector.shape_cast %69 : vector<1x8x128xf32> to vector<8x128xf32>
    %71 = arith.truncf %63 : vector<8x128xf32> to vector<8x128xbf16>
    %cst_30 = arith.constant dense<0.000000e+00> : vector<8x128xf32>
    %72 = tpu.matmul %71, %0, %cst_30 {dimension_numbers = #tpu.dot_dimension_numbers<[1], [0], [0], [1], [0, 0, 1, 1], [], []>} : vector<8x128xbf16>, vector<128x128xbf16>, vector<8x128xf32> -> vector<8x128xf32>
    %73 = arith.addf %70, %72 : vector<8x128xf32>
    %74 = vector.broadcast %1 : vector<1x128xf32> to vector<8x128xf32>
    %75 = arith.addf %73, %74 : vector<8x128xf32>
    %76 = math.tanh %75 : vector<8x128xf32>
    %c8_i32_31 = arith.constant 8 : i32
    %77 = arith.muli %c5_i32, %c8_i32_31 : i32
    %78 = tpu.assume_multiple %77, 8 : i32
    %79 = arith.index_cast %78 : i32 to index
    %c0_32 = arith.constant 0 : index
    %80 = vector.load %arg9[%79, %c0_32] : memref<64x128xf32, #tpu.memory_space<vmem>>, vector<8x128xf32>
    tpu.vector_store %arg9[%79, %c0_32], %76 {strides = array<i32>} : memref<64x128xf32, #tpu.memory_space<vmem>>, vector<8x128xf32>,
    %c6_i32 = arith.constant 6 : i32
    %81 = arith.index_cast %c6_i32 : i32 to index
    %c0_33 = arith.constant 0 : index
    %c0_34 = arith.constant 0 : index
    %82 = vector.load %arg1[%81, %c0_33, %c0_34] : memref<8x8x128xf32, #tpu.memory_space<vmem>>, vector<1x8x128xf32>
    %83 = vector.shape_cast %82 : vector<1x8x128xf32> to vector<8x128xf32>
    %84 = arith.truncf %76 : vector<8x128xf32> to vector<8x128xbf16>
    %cst_35 = arith.constant dense<0.000000e+00> : vector<8x128xf32>
    %85 = tpu.matmul %84, %0, %cst_35 {dimension_numbers = #tpu.dot_dimension_numbers<[1], [0], [0], [1], [0, 0, 1, 1], [], []>} : vector<8x128xbf16>, vector<128x128xbf16>, vector<8x128xf32> -> vector<8x128xf32>
    %86 = arith.addf %83, %85 : vector<8x128xf32>
    %87 = vector.broadcast %1 : vector<1x128xf32> to vector<8x128xf32>
    %88 = arith.addf %86, %87 : vector<8x128xf32>
    %89 = math.tanh %88 : vector<8x128xf32>
    %c8_i32_36 = arith.constant 8 : i32
    %90 = arith.muli %c6_i32, %c8_i32_36 : i32
    %91 = tpu.assume_multiple %90, 8 : i32
    %92 = arith.index_cast %91 : i32 to index
    %c0_37 = arith.constant 0 : index
    %93 = vector.load %arg9[%92, %c0_37] : memref<64x128xf32, #tpu.memory_space<vmem>>, vector<8x128xf32>
    tpu.vector_store %arg9[%92, %c0_37], %89 {strides = array<i32>} : memref<64x128xf32, #tpu.memory_space<vmem>>, vector<8x128xf32>,
    %c7_i32 = arith.constant 7 : i32
    %94 = arith.index_cast %c7_i32 : i32 to index
    %c0_38 = arith.constant 0 : index
    %c0_39 = arith.constant 0 : index
    %95 = vector.load %arg1[%94, %c0_38, %c0_39] : memref<8x8x128xf32, #tpu.memory_space<vmem>>, vector<1x8x128xf32>
    %96 = vector.shape_cast %95 : vector<1x8x128xf32> to vector<8x128xf32>
    %97 = arith.truncf %89 : vector<8x128xf32> to vector<8x128xbf16>
    %cst_40 = arith.constant dense<0.000000e+00> : vector<8x128xf32>
    %98 = tpu.matmul %97, %0, %cst_40 {dimension_numbers = #tpu.dot_dimension_numbers<[1], [0], [0], [1], [0, 0, 1, 1], [], []>} : vector<8x128xbf16>, vector<128x128xbf16>, vector<8x128xf32> -> vector<8x128xf32>
    %99 = arith.addf %96, %98 : vector<8x128xf32>
    %100 = vector.broadcast %1 : vector<1x128xf32> to vector<8x128xf32>
    %101 = arith.addf %99, %100 : vector<8x128xf32>
    %102 = math.tanh %101 : vector<8x128xf32>
    %c8_i32_41 = arith.constant 8 : i32
    %103 = arith.muli %c7_i32, %c8_i32_41 : i32
    %104 = tpu.assume_multiple %103, 8 : i32
    %105 = arith.index_cast %104 : i32 to index
    %c0_42 = arith.constant 0 : index
    %106 = vector.load %arg9[%105, %c0_42] : memref<64x128xf32, #tpu.memory_space<vmem>>, vector<8x128xf32>
    tpu.vector_store %arg9[%105, %c0_42], %102 {strides = array<i32>} : memref<64x128xf32, #tpu.memory_space<vmem>>, vector<8x128xf32>,
    %c8_i32_43 = arith.constant 8 : i32
    %c0_44 = arith.constant 0 : index
    %c0_45 = arith.constant 0 : index
    %107 = vector.load %arg8[%c0_44, %c0_45] : memref<8x128xf32, #tpu.memory_space<vmem>>, vector<8x128xf32>
    tpu.vector_store %arg8[%c0_44, %c0_45], %102 {strides = array<i32>} : memref<8x128xf32, #tpu.memory_space<vmem>>, vector<8x128xf32>,
    %c0_46 = arith.constant 0 : index
    %c0_47 = arith.constant 0 : index
    %108 = vector.load %arg9[%c0_46, %c0_47] : memref<64x128xf32, #tpu.memory_space<vmem>>, vector<64x128xf32>
    %109 = arith.truncf %108 : vector<64x128xf32> to vector<64x128xbf16>
    %c0_48 = arith.constant 0 : index
    %c0_49 = arith.constant 0 : index
    %110 = vector.load %arg5[%c0_48, %c0_49] : memref<128x128xbf16, #tpu.memory_space<vmem>>, vector<128x128xbf16>
    %cst_50 = arith.constant dense<0.000000e+00> : vector<64x128xf32>
    %111 = tpu.matmul %109, %110, %cst_50 {dimension_numbers = #tpu.dot_dimension_numbers<[1], [0], [0], [1], [0, 0, 1, 1], [], []>} : vector<64x128xbf16>, vector<128x128xbf16>, vector<64x128xf32> -> vector<64x128xf32>
    %c0_51 = arith.constant 0 : index
    %c0_52 = arith.constant 0 : index
    %112 = vector.load %arg6[%c0_51, %c0_52] : memref<1x128xf32, #tpu.memory_space<vmem>>, vector<1x128xf32>
    %113 = vector.broadcast %112 : vector<1x128xf32> to vector<64x128xf32>
    %114 = arith.addf %111, %113 : vector<64x128xf32>
    %cst_53 = arith.constant dense<0xFF800000> : vector<64xf32>
    %115 = vector.multi_reduction <maximumf>, %114, %cst_53 [1] : vector<64x128xf32> to vector<64xf32>
    %116 = vector.shape_cast %115 : vector<64xf32> to vector<64x1xf32>
    %117 = vector.broadcast %116 : vector<64x1xf32> to vector<64x128xf32>
    %118 = arith.subf %114, %117 : vector<64x128xf32>
    %119 = math.exp %118 : vector<64x128xf32>
    %cst_54 = arith.constant dense<0.000000e+00> : vector<64xf32>
    %120 = vector.multi_reduction <add>, %119, %cst_54 [1] : vector<64x128xf32> to vector<64xf32>
    %121 = vector.shape_cast %120 : vector<64xf32> to vector<64x1xf32>
    %122 = math.log %121 : vector<64x1xf32>
    %123 = arith.addf %122, %116 : vector<64x1xf32>
    %124 = vector.broadcast %123 : vector<64x1xf32> to vector<64x128xf32>
    %125 = arith.subf %114, %124 : vector<64x128xf32>
    %126 = vector.shape_cast %125 : vector<64x128xf32> to vector<8x8x128xf32>
    %c0_55 = arith.constant 0 : index
    %c0_56 = arith.constant 0 : index
    %c0_57 = arith.constant 0 : index
    %127 = vector.load %arg7[%c0_55, %c0_56, %c0_57] : memref<8x8x128xf32, #tpu.memory_space<vmem>>, vector<8x8x128xf32>
    tpu.vector_store %arg7[%c0_55, %c0_56, %c0_57], %126 {strides = array<i32>} : memref<8x8x128xf32, #tpu.memory_space<vmem>>, vector<8x8x128xf32>,
    return
  }
  func.func @transform_0(%arg0: i32) -> (i32, i32, i32) {
    %c0_i32 = arith.constant 0 : i32
    %c0_i32_0 = arith.constant 0 : i32
    %c0_i32_1 = arith.constant 0 : i32
    return %c0_i32, %arg0, %c0_i32_0 : i32, i32, i32
  }
  func.func @transform_1(%arg0: i32) -> (i32, i32) {
    %c0_i32 = arith.constant 0 : i32
    %c0_i32_0 = arith.constant 0 : i32
    return %arg0, %c0_i32 : i32, i32
  }
  func.func @transform_2(%arg0: i32) -> (i32, i32) {
    %c0_i32 = arith.constant 0 : i32
    %c0_i32_0 = arith.constant 0 : i32
    %c0_i32_1 = arith.constant 0 : i32
    return %c0_i32, %c0_i32_0 : i32, i32
  }
  func.func @transform_3(%arg0: i32) -> (i32, i32) {
    %c0_i32 = arith.constant 0 : i32
    %c0_i32_0 = arith.constant 0 : i32
    %c0_i32_1 = arith.constant 0 : i32
    return %c0_i32, %c0_i32_0 : i32, i32
  }
  func.func @transform_4(%arg0: i32) -> (i32, i32) {
    %c0_i32 = arith.constant 0 : i32
    %c0_i32_0 = arith.constant 0 : i32
    %c0_i32_1 = arith.constant 0 : i32
    return %c0_i32, %c0_i32_0 : i32, i32
  }
  func.func @transform_5(%arg0: i32) -> (i32, i32) {
    %c0_i32 = arith.constant 0 : i32
    %c0_i32_0 = arith.constant 0 : i32
    %c0_i32_1 = arith.constant 0 : i32
    return %c0_i32, %c0_i32_0 : i32, i32
  }
  func.func @transform_6(%arg0: i32) -> (i32, i32, i32) {
    %c0_i32 = arith.constant 0 : i32
    %c0_i32_0 = arith.constant 0 : i32
    %c0_i32_1 = arith.constant 0 : i32
    return %c0_i32, %arg0, %c0_i32_0 : i32, i32, i32
  }
  func.func @transform_7(%arg0: i32) -> (i32, i32) {
    %c0_i32 = arith.constant 0 : i32
    %c0_i32_0 = arith.constant 0 : i32
    return %arg0, %c0_i32 : i32, i32
  }
}

</mosaic_0001>

<bundles_post_ra>
// kernel: rnn_forward_sequences.1
= control target key start
LH: loop header
LB: loop body
LE: loop exit
PB: predicated region body
PF: predicated region fallthrough
CT: control target
= control target key end

     0   :  { %13 = vsyncpa [#allocation6], 0  ;;  %s2234_s0 = inlined_call_operand.vmem [shape: f32[8,16,128], index: 0, kind: input, shape index: {}]   ;;  %s2235_s1 = inlined_call_operand.vmem [shape: f32[16,128], index: 1, kind: input, shape index: {}]   ;;  %s2236_s2 = inlined_call_operand.vmem [shape: bf16[128,128], index: 2, kind: input, shape index: {}]   ;;  %s2237_s3 = inlined_call_operand.vmem [shape: f32[1,128], index: 3, kind: input, shape index: {}]   ;;  %s2238_s4 = inlined_call_operand.vmem [shape: bf16[128,128], index: 4, kind: input, shape index: {}]   ;;  %s2239_s5 = inlined_call_operand.vmem [shape: f32[1,128], index: 5, kind: input, shape index: {}]   ;;  %s2240_s6 = inlined_call_operand.vmem [shape: f32[8,16,128], index: 6, kind: output, shape index: {0}]   ;;  %s2241_s7 = inlined_call_operand.hbm [shape: f32[16,128], index: 7, kind: output, shape index: {1}]  }
   0x1   :  { %15 = vsyncpa [#allocation6 + $0x1], 0  ;;  %s1772_s24 = smov 0   ;;  %s1774_s25 = smov 0  }
   0x2   :  { %s1776_s26 = smov 0   ;;  %s1778_s27 = smov 0  }
   0x3 LB: > { %s1793_s28 = sadd.s32 4294967295, %s1727_s27   ;;  %s1253_s29 = sadd.s32 4294967294, %s1727_s27   ;;  %s1727_s27 = sphi %s1778_s27, %s2249_s27   ;;  %s1723_s26 = sphi %s1776_s26, %s2248_s26   ;;  %s1719_s25 = sphi %s1774_s25, %s2247_s25   ;;  %s1715_s24 = sphi %s1772_s24, %s2246_s24  }
   0x4   : > { %s1797_s30 = sadd.s32 1, %s1727_s27   ;;  %s28_s8 = sadd.s32 1, %s1723_s26 }
   0x5   : > { %s25_s9 = ssub.s32 %s1727_s27, %s1797_s30  ;;  %p35_p0 = scmp.ne.s32.totalorder %s1723_s26, %s1719_s25 }
   0x6   : > { %p26_p1 = scmp.eq.s32.totalorder %s25_s9, 0  ;;  %p36_p2 = scmp.eq.s32.totalorder %s1727_s27, 0 }
   0x7   : > { %p175_p3 = scmp.eq.s32.totalorder %s1793_s28, 1  ;;  %p206_p4 = scmp.ne.s32.totalorder %s1719_s25, %s1715_s24 }
   0x8   : > { %s1809_s10 = scalar_select %p26_p1, %s1723_s26, %s28_s8  }
   0x9   : > { %p37_p5 = por %p36_p2, %p35_p0  ;;  %p1811_p6 = por %p175_p3, %p35_p0 }
   0xa   : > { %p207_p7 = scmp.eq.s32.totalorder %s1253_s29, 1  ;;  %p2242_p9 = scmp.ge.s32.totalorder %s1727_s27, 2 }
   0xc   : > { %p1815_p8 = por %p207_p7, %p206_p4  ;;  %235 = sbr.rel (%p2242_p9) target bundleno = 25 (0x19), region = 32 }
  0x11   : > { %238 = sbr.rel (!%p37_p5) target bundleno = 25 (0x19), region = 36  ;;  %s240_s13 = sand.u32 (%p37_p5), 1, %s1723_s26  }
  0x12   : > { %s1257_s14 = sshll.u32 (%p37_p5), %s1727_s27, 3  ;;  %s1256_s15 = sshll.u32 (%p37_p5), %s240_s13, 6 }
  0x13   : > { %s244_s18 = scalar_lea.vmem (%p37_p5), %s2234_s0, %s1257_s14  ;;  %s242_s19 = scalar_lea.vmem (%p37_p5), [#allocation3], %s1256_s15 }
  0x14   : > { %v287_v0 = vld [vmem:[%s244_s18] sm:$0xff] (%p37_p5)  ;;  %v289_v1 = vld [vmem:[%s244_s18 + $0x10] sm:$0xff] (%p37_p5) }
  0x15   : > { %v291_v2 = vld [vmem:[%s244_s18 + $0x20] sm:$0xff] (%p37_p5)  ;;  %288 = vst [vmem:[%s242_s19] sm:$0xff] (%p37_p5), %v287_v0  ;;  %290 = vst [vmem:[%s242_s19 + $0x8] sm:$0xff] (%p37_p5), %v289_v1  ;;  %v293_v3 = vld [vmem:[%s244_s18 + $0x30] sm:$0xff] (%p37_p5) }
  0x16   : > { %292 = vst [vmem:[%s242_s19 + $0x10] sm:$0xff] %v291_v2  ;;  %v295_v4 = vld [vmem:[%s244_s18 + $0x40] sm:$0xff]  ;;  %v297_v5 = vld [vmem:[%s244_s18 + $0x50] sm:$0xff]  ;;  %294 = vst [vmem:[%s242_s19 + $0x18] sm:$0xff] %v293_v3 }
  0x17   : > { %296 = vst [vmem:[%s242_s19 + $0x20] sm:$0xff] %v295_v4  ;;  %298 = vst [vmem:[%s242_s19 + $0x28] sm:$0xff] %v297_v5  ;;  %v299_v6 = vld [vmem:[%s244_s18 + $0x60] sm:$0xff]  ;;  %v301_v7 = vld [vmem:[%s244_s18 + $0x70] sm:$0xff] }
  0x18   : > { %300 = vst [vmem:[%s242_s19 + $0x30] sm:$0xff] %v299_v6  ;;  %302 = vst [vmem:[%s242_s19 + $0x38] sm:$0xff] %v301_v7 }
  0x19 PF: > { %p1258_p10 = scmp.ge.s32.totalorder %s1727_s27, 1  ;;  %p314_p11 = scmp.lt.s32.totalorder %s1727_s27, 3 }
  0x1b   : > { %p315_p12 = pnand %p1258_p10, %p314_p11 }
  0x1c   : > { %p360_p13 = scmp.lt.s32.totalorder (!%p315_p12), %s1793_s28, 1  ;;  %s1931_s13 = sand.u32 (!%p315_p12), 1, %s1719_s25  }
  0x1d   : > { %318 = sbr.rel (%p315_p12) target bundleno = 2322 (0x912), region = 78  ;;  %s1259_s14 = sshll.u32 (!%p315_p12), %s1931_s13, 6 }
  0x1e   : > { %s1936_s15 = scalar_lea.vmem (!%p315_p12), [#allocation3], %s1259_s14  ;;  %s1261_s8 = sshll.u32 (!%p315_p12), %s1931_s13, 3 }
  0x1f   : > { %s2107_s9 = scalar_lea.vmem (!%p315_p12), [#allocation5], %s1261_s8 }
  0x22   : > { %v1832_v8 = vld [vmem:[%s2236_s2 + $0x38] sm:$0xff]   ;;  %v1729_v9 = vmov 0.0   ;;  %v1840_v10 = vld [vmem:[%s2236_s2 + $0x30] sm:$0xff]   ;;  %vm1730_vm0 = vmmov 0   ;;  %v1853_v11 = vld [vmem:[%s2236_s2 + $0x28] sm:$0xff]   ;;  %s361_s16 = scalar_select %p360_p13, %s1793_s28, 1 }
  0x23   : > { %1378 = vmatprep.subr.bf16.mxu1 %v1729_v9  ;;  %1418 = vmatprep.subr.bf16.mxu0 %v1729_v9  ;;  %v1860_v12 = vld [vmem:[%s2236_s2 + $0x20] sm:$0xff]   ;;  %v1872_v13 = vld [vmem:[%s2236_s2 + $0x18] sm:$0xff]   ;;  %v1882_v14 = vld [vmem:[%s2236_s2 + $0x10] sm:$0xff]  }
  0x24   : > { %1379 = vmatpush3.bf16.msra.mxu1 %v1832_v8  ;;  %1394 = vmatprep.mubr.msk.bf16.mxu1 %vm1730_vm0, %v1729_v9  ;;  %s1262_s19 = sshll.u32 %s361_s16, 3  ;;  %v1891_v15 = vld [vmem:[%s2236_s2 + $0x8] sm:$0xff]   ;;  %v1903_v16 = vld [vmem:[%s2236_s2] sm:$0xff]   ;;  %v1273_v38 = vld [vmem:[%s1936_s15 + $0x10] sm:$0xff]  ;;  %s1290_s16 = sshll.u32 (%p1811_p6), %s1793_s28, 3 }
  0x25   : > { %1380 = vmatprep.subr.bf16.mxu1 %v1729_v9  ;;  %1419 = vmatpush3.bf16.msra.mxu0 %v1832_v8  ;;  %s363_s29 = scalar_lea.vmem %s2235_s1, %s1262_s19  ;;  %v383_v19 = vld [vmem:[%s1936_s15] sm:$0xff]  ;;  %v1272_v29 = vld [vmem:[%s1936_s15 + $0x8] sm:$0xff]  ;;  %v1274_v47 = vld [vmem:[%s1936_s15 + $0x18] sm:$0xff]  ;;  %s1077_s19 = scalar_lea.vmem (%p1811_p6), %s2240_s6, %s1290_s16 }
  0x26   : > { %1420 = vmatprep.subr.bf16.mxu0 %v1729_v9  ;;  %1434 = vmatprep.mubr.msk.bf16.mxu0 %vm1730_vm0, %v1729_v9  ;;  %v382_v17 = vld [vmem:[%s363_s29] sm:$0xff]  ;;  %v1611_v1 = vld [vmem:[%s2238_s4 + $0x38] sm:$0xff]   ;;  %v1276_v2 = vld [vmem:[%s1936_s15 + $0x28] sm:$0xff] }
  0x27   : > { %v384_v18 = vpack.c.bf16 %v382_v17, %v382_v17  ;;  %v1942_v20 = vld [vmem:[%s2237_s3] ss:$0 sm:$0xff]  ;;  %v1617_v17 = vld [vmem:[%s2238_s4 + $0x8] sm:$0xff]  }
  0x28   : > { %1381 = vmatpush3.bf16.msra.mxu1 %v1840_v10  ;;  %v1275_v56 = vld [vmem:[%s1936_s15 + $0x20] sm:$0xff] }
  0x29   : > { %1382 = vmatprep.subr.bf16.mxu1 %v1729_v9  ;;  %1421 = vmatpush3.bf16.msra.mxu0 %v1840_v10 }
  0x2a   : > { %1422 = vmatprep.subr.bf16.mxu0 %v1729_v9 }
  0x2c   : > { %1383 = vmatpush3.bf16.msra.mxu1 %v1853_v11 }
  0x2d   : > { %1384 = vmatprep.subr.bf16.mxu1 %v1729_v9  ;;  %1423 = vmatpush3.bf16.msra.mxu0 %v1853_v11 }
  0x2e   : > { %1424 = vmatprep.subr.bf16.mxu0 %v1729_v9 }
  0x30   : > { %1385 = vmatpush3.bf16.msra.mxu1 %v1860_v12 }
  0x31   : > { %1386 = vmatprep.subr.bf16.mxu1 %v1729_v9  ;;  %1425 = vmatpush3.bf16.msra.mxu0 %v1860_v12 }
  0x32   : > { %1426 = vmatprep.subr.bf16.mxu0 %v1729_v9 }
  0x34   : > { %1387 = vmatpush3.bf16.msra.mxu1 %v1872_v13 }
  0x35   : > { %1388 = vmatprep.subr.bf16.mxu1 %v1729_v9  ;;  %1427 = vmatpush3.bf16.msra.mxu0 %v1872_v13 }
  0x36   : > { %1428 = vmatprep.subr.bf16.mxu0 %v1729_v9 }
  0x38   : > { %1389 = vmatpush3.bf16.msra.mxu1 %v1882_v14 }
  0x39   : > { %1390 = vmatprep.subr.bf16.mxu1 %v1729_v9  ;;  %1429 = vmatpush3.bf16.msra.mxu0 %v1882_v14 }
  0x3a   : > { %1430 = vmatprep.subr.bf16.mxu0 %v1729_v9 }
  0x3c   : > { %1391 = vmatpush3.bf16.msra.mxu1 %v1891_v15 }
  0x3d   : > { %1392 = vmatprep.subr.bf16.mxu1 %v1729_v9  ;;  %1431 = vmatpush3.bf16.msra.mxu0 %v1891_v15 }
  0x3e   : > { %1432 = vmatprep.subr.bf16.mxu0 %v1729_v9 }
  0x40   : > { %1393 = vmatpush3.bf16.msra.mxu1 %v1903_v16 }
  0x41   : > { %1398 = vmatprep.subr.bf16.mxu1 %v1729_v9  ;;  %1433 = vmatpush3.bf16.msra.mxu0 %v1903_v16 }
  0x42   : > { %1458 = vmatprep.subr.bf16.mxu0 %v1729_v9 }
  0x43   : > { %1395 = vmatmul.mubr.bf16.vlgmr.msra.gmra.mxu1 %v384_v18  ;;  %v1618_v18 = vld [vmem:[%s2238_s4] sm:$0xff]  }
  0x44   : > { %1399 = vmatpush3.bf16.msra.mxu1 %v1832_v8  ;;  %1414 = vmatprep.mubr.msk.bf16.mxu1 %vm1730_vm0, %v1729_v9 }
  0x45   : > { %1400 = vmatprep.subr.bf16.mxu1 %v1729_v9 }
  0x48   : > { %1401 = vmatpush3.bf16.msra.mxu1 %v1840_v10 }
  0x49   : > { %1402 = vmatprep.subr.bf16.mxu1 %v1729_v9 }
  0x4c   : > { %1403 = vmatpush3.bf16.msra.mxu1 %v1853_v11 }
  0x4d   : > { %1404 = vmatprep.subr.bf16.mxu1 %v1729_v9 }
  0x50   : > { %1405 = vmatpush3.bf16.msra.mxu1 %v1860_v12 }
  0x51   : > { %1406 = vmatprep.subr.bf16.mxu1 %v1729_v9 }
  0x54   : > { %1407 = vmatpush3.bf16.msra.mxu1 %v1872_v13 }
  0x55   : > { %1408 = vmatprep.subr.bf16.mxu1 %v1729_v9 }
  0x58   : > { %1409 = vmatpush3.bf16.msra.mxu1 %v1882_v14 }
  0x59   : > { %1410 = vmatprep.subr.bf16.mxu1 %v1729_v9 }
  0x5c   : > { %1411 = vmatpush3.bf16.msra.mxu1 %v1891_v15 }
  0x5d   : > { %1412 = vmatprep.subr.bf16.mxu1 %v1729_v9 }
  0x60   : > { %1413 = vmatpush3.bf16.msra.mxu1 %v1903_v16 }
  0x61   : > { %1438 = vmatprep.subr.bf16.mxu1 %v1729_v9 }
 0x103   : > { %v467_v21 = vpop.f32.mrf.mxu1 }
 0x104   : > { %v473_v22 = vadd.f32 %v467_v21, %v383_v19 }
 0x105   : > { %v1396_v23 = vpop.f32.mrf.mxu1 }
 0x106   : > { %v480_v24 = vadd.f32 %v1942_v20, %v473_v22  ;;  %v1277_v22 = vld [vmem:[%s1936_s15 + $0x30] sm:$0xff] }
 0x107   : > { %v470_v25 = vpop.f32.mrf.mxu1 }
 0x108   : > { %1619 = vtanh.f32 %v480_v24 }
 0x109   : > { %v1397_v26 = vpop.f32.mrf.mxu1 }
 0x115   : > { %v1945_v27 = vpop.eup %1619 }
 0x116   : > { %v485_v28 = vpack.c.bf16 %v1945_v27, %v1945_v27 }
 0x118   : > { %1415 = vmatmul.mubr.bf16.vlgmr.msra.gmra.mxu1 %v485_v28 }
 0x119   : > { %1439 = vmatpush3.bf16.msra.mxu1 %v1832_v8  ;;  %1454 = vmatprep.mubr.msk.bf16.mxu1 %vm1730_vm0, %v1729_v9 }
 0x11a   : > { %1440 = vmatprep.subr.bf16.mxu1 %v1729_v9 }
 0x11d   : > { %1441 = vmatpush3.bf16.msra.mxu1 %v1840_v10 }
 0x11e   : > { %1442 = vmatprep.subr.bf16.mxu1 %v1729_v9 }
 0x121   : > { %1443 = vmatpush3.bf16.msra.mxu1 %v1853_v11 }
 0x122   : > { %1444 = vmatprep.subr.bf16.mxu1 %v1729_v9 }
 0x125   : > { %1445 = vmatpush3.bf16.msra.mxu1 %v1860_v12 }
 0x126   : > { %1446 = vmatprep.subr.bf16.mxu1 %v1729_v9 }
 0x129   : > { %1447 = vmatpush3.bf16.msra.mxu1 %v1872_v13 }
 0x12a   : > { %1448 = vmatprep.subr.bf16.mxu1 %v1729_v9 }
 0x12d   : > { %1449 = vmatpush3.bf16.msra.mxu1 %v1882_v14 }
 0x12e   : > { %1450 = vmatprep.subr.bf16.mxu1 %v1729_v9 }
 0x131   : > { %1451 = vmatpush3.bf16.msra.mxu1 %v1891_v15 }
 0x132   : > { %1452 = vmatprep.subr.bf16.mxu1 %v1729_v9 }
 0x135   : > { %1453 = vmatpush3.bf16.msra.mxu1 %v1903_v16 }
 0x136   : > { %1478 = vmatprep.subr.bf16.mxu1 %v1729_v9 }
 0x1d8   : > { %v520_v30 = vpop.f32.mrf.mxu1 }
 0x1d9   : > { %v526_v31 = vadd.f32 %v1272_v29, %v520_v30 }
 0x1da   : > { %v1416_v32 = vpop.f32.mrf.mxu1 }
 0x1db   : > { %v527_v33 = vadd.f32 %v1942_v20, %v526_v31  ;;  %v1279_v31 = vld [vmem:[%s2239_s5] ss:$0 sm:$0xff] }
 0x1dc   : > { %v523_v34 = vpop.f32.mrf.mxu1 }
 0x1dd   : > { %1621 = vtanh.f32 %v527_v33 }
 0x1de   : > { %v1417_v35 = vpop.f32.mrf.mxu1 }
 0x1ea   : > { %v1969_v36 = vpop.eup %1621 }
 0x1eb   : > { %v533_v37 = vpack.c.bf16 %v1969_v36, %v1969_v36 }
 0x1ed   : > { %1435 = vmatmul.mubr.bf16.vlgmr.msra.gmra.mxu0 %v533_v37 }
 0x1ee   : > { %1459 = vmatpush3.bf16.msra.mxu0 %v1832_v8  ;;  %1474 = vmatprep.mubr.msk.bf16.mxu0 %vm1730_vm0, %v1729_v9 }
 0x1ef   : > { %1460 = vmatprep.subr.bf16.mxu0 %v1729_v9 }
 0x1f2   : > { %1461 = vmatpush3.bf16.msra.mxu0 %v1840_v10 }
 0x1f3   : > { %1462 = vmatprep.subr.bf16.mxu0 %v1729_v9 }
 0x1f6   : > { %1463 = vmatpush3.bf16.msra.mxu0 %v1853_v11 }
 0x1f7   : > { %1464 = vmatprep.subr.bf16.mxu0 %v1729_v9 }
 0x1fa   : > { %1465 = vmatpush3.bf16.msra.mxu0 %v1860_v12 }
 0x1fb   : > { %1466 = vmatprep.subr.bf16.mxu0 %v1729_v9 }
 0x1fe   : > { %1467 = vmatpush3.bf16.msra.mxu0 %v1872_v13 }
 0x1ff   : > { %1468 = vmatprep.subr.bf16.mxu0 %v1729_v9 }
 0x202   : > { %1469 = vmatpush3.bf16.msra.mxu0 %v1882_v14 }
 0x203   : > { %1470 = vmatprep.subr.bf16.mxu0 %v1729_v9 }
 0x206   : > { %1471 = vmatpush3.bf16.msra.mxu0 %v1891_v15 }
 0x207   : > { %1472 = vmatprep.subr.bf16.mxu0 %v1729_v9 }
 0x20a   : > { %1473 = vmatpush3.bf16.msra.mxu0 %v1903_v16 }
 0x20b   : > { %1498 = vmatprep.subr.bf16.mxu0 %v1729_v9 }
 0x2ad   : > { %v568_v39 = vpop.f32.mrf.mxu0 }
 0x2ae   : > { %v574_v40 = vadd.f32 %v1273_v38, %v568_v39 }
 0x2af   : > { %v1436_v41 = vpop.f32.mrf.mxu0 }
 0x2b0   : > { %v575_v42 = vadd.f32 %v1942_v20, %v574_v40  ;;  %v1278_v40 = vld [vmem:[%s1936_s15 + $0x38] sm:$0xff]  ;;  %s2159_s15 = scalar_lea.vmem [#allocation4], %s1259_s14  ;;  %s1069_s14 = scalar_lea.sflag [#allocation6], %s1931_s13 }
 0x2b1   : > { %v571_v43 = vpop.f32.mrf.mxu0 }
 0x2b2   : > { %1623 = vtanh.f32 %v575_v42 }
 0x2b3   : > { %v1437_v44 = vpop.f32.mrf.mxu0 }
 0x2bf   : > { %v1993_v45 = vpop.eup %1623 }
 0x2c0   : > { %v581_v46 = vpack.c.bf16 %v1993_v45, %v1993_v45 }
 0x2c2   : > { %1455 = vmatmul.mubr.bf16.vlgmr.msra.gmra.mxu1 %v581_v46 }
 0x2c3   : > { %1479 = vmatpush3.bf16.msra.mxu1 %v1832_v8  ;;  %1494 = vmatprep.mubr.msk.bf16.mxu1 %vm1730_vm0, %v1729_v9 }
 0x2c4   : > { %1480 = vmatprep.subr.bf16.mxu1 %v1729_v9 }
 0x2c7   : > { %1481 = vmatpush3.bf16.msra.mxu1 %v1840_v10 }
 0x2c8   : > { %1482 = vmatprep.subr.bf16.mxu1 %v1729_v9 }
 0x2cb   : > { %1483 = vmatpush3.bf16.msra.mxu1 %v1853_v11 }
 0x2cc   : > { %1484 = vmatprep.subr.bf16.mxu1 %v1729_v9 }
 0x2cf   : > { %1485 = vmatpush3.bf16.msra.mxu1 %v1860_v12 }
 0x2d0   : > { %1486 = vmatprep.subr.bf16.mxu1 %v1729_v9 }
 0x2d3   : > { %1487 = vmatpush3.bf16.msra.mxu1 %v1872_v13 }
 0x2d4   : > { %1488 = vmatprep.subr.bf16.mxu1 %v1729_v9 }
 0x2d7   : > { %1489 = vmatpush3.bf16.msra.mxu1 %v1882_v14 }
 0x2d8   : > { %1490 = vmatprep.subr.bf16.mxu1 %v1729_v9 }
 0x2db   : > { %1491 = vmatpush3.bf16.msra.mxu1 %v1891_v15 }
 0x2dc   : > { %1492 = vmatprep.subr.bf16.mxu1 %v1729_v9 }
 0x2df   : > { %1493 = vmatpush3.bf16.msra.mxu1 %v1903_v16 }
 0x2e0   : > { %1518 = vmatprep.subr.bf16.mxu1 %v1729_v9 }
 0x382   : > { %v616_v48 = vpop.f32.mrf.mxu1 }
 0x383   : > { %v622_v49 = vadd.f32 %v1274_v47, %v616_v48 }
 0x384   : > { %v1456_v50 = vpop.f32.mrf.mxu1 }
 0x385   : > { %v623_v51 = vadd.f32 %v1942_v20, %v622_v49 }
 0x386   : > { %v619_v52 = vpop.f32.mrf.mxu1 }
 0x387   : > { %1625 = vtanh.f32 %v623_v51 }
 0x388   : > { %v1457_v53 = vpop.f32.mrf.mxu1 }
 0x394   : > { %v2017_v54 = vpop.eup %1625 }
 0x395   : > { %v629_v55 = vpack.c.bf16 %v2017_v54, %v2017_v54  ;;  %v829_v19 = vpack.c.bf16 %v2017_v54, %v1993_v45 }
 0x397   : > { %1475 = vmatmul.mubr.bf16.vlgmr.msra.gmra.mxu0 %v629_v55 }
 0x398   : > { %1499 = vmatpush3.bf16.msra.mxu0 %v1832_v8  ;;  %1514 = vmatprep.mubr.msk.bf16.mxu0 %vm1730_vm0, %v1729_v9 }
 0x399   : > { %1500 = vmatprep.subr.bf16.mxu0 %v1729_v9 }
 0x39c   : > { %1501 = vmatpush3.bf16.msra.mxu0 %v1840_v10 }
 0x39d   : > { %1502 = vmatprep.subr.bf16.mxu0 %v1729_v9 }
 0x3a0   : > { %1503 = vmatpush3.bf16.msra.mxu0 %v1853_v11 }
 0x3a1   : > { %1504 = vmatprep.subr.bf16.mxu0 %v1729_v9 }
 0x3a4   : > { %1505 = vmatpush3.bf16.msra.mxu0 %v1860_v12 }
 0x3a5   : > { %1506 = vmatprep.subr.bf16.mxu0 %v1729_v9 }
 0x3a8   : > { %1507 = vmatpush3.bf16.msra.mxu0 %v1872_v13 }
 0x3a9   : > { %1508 = vmatprep.subr.bf16.mxu0 %v1729_v9 }
 0x3ac   : > { %1509 = vmatpush3.bf16.msra.mxu0 %v1882_v14 }
 0x3ad   : > { %1510 = vmatprep.subr.bf16.mxu0 %v1729_v9 }
 0x3b0   : > { %1511 = vmatpush3.bf16.msra.mxu0 %v1891_v15 }
 0x3b1   : > { %1512 = vmatprep.subr.bf16.mxu0 %v1729_v9 }
 0x3b4   : > { %1513 = vmatpush3.bf16.msra.mxu0 %v1903_v16 }
 0x3b5   : > { %1538 = vmatprep.subr.bf16.mxu0 %v1611_v1 }
 0x457   : > { %v664_v57 = vpop.f32.mrf.mxu0 }
 0x458   : > { %v670_v58 = vadd.f32 %v1275_v56, %v664_v57 }
 0x459   : > { %v1476_v59 = vpop.f32.mrf.mxu0 }
 0x45a   : > { %v671_v60 = vadd.f32 %v1942_v20, %v670_v58 }
 0x45b   : > { %v667_v61 = vpop.f32.mrf.mxu0 }
 0x45c   : > { %1627 = vtanh.f32 %v671_v60 }
 0x45d   : > { %v1477_v62 = vpop.f32.mrf.mxu0 }
 0x469   : > { %v1628_v63 = vpop.eup %1627 }
 0x46a   : > { %v677_v0 = vpack.c.bf16 %v1628_v63, %v1628_v63 }
 0x46c   : > { %1495 = vmatmul.mubr.bf16.vlgmr.msra.gmra.mxu1 %v677_v0 }
 0x46d   : > { %1519 = vmatpush3.bf16.msra.mxu1 %v1832_v8  ;;  %1534 = vmatprep.mubr.msk.bf16.mxu1 %vm1730_vm0, %v1729_v9 }
 0x46e   : > { %1520 = vmatprep.subr.bf16.mxu1 %v1729_v9 }
 0x471   : > { %1521 = vmatpush3.bf16.msra.mxu1 %v1840_v10 }
 0x472   : > { %1522 = vmatprep.subr.bf16.mxu1 %v1729_v9 }
 0x475   : > { %1523 = vmatpush3.bf16.msra.mxu1 %v1853_v11 }
 0x476   : > { %1524 = vmatprep.subr.bf16.mxu1 %v1729_v9 }
 0x479   : > { %1525 = vmatpush3.bf16.msra.mxu1 %v1860_v12  ;;  %v828_v12 = vpack.c.bf16 %v1969_v36, %v1945_v27 }
 0x47a   : > { %1526 = vmatprep.subr.bf16.mxu1 %v1729_v9 }
 0x47d   : > { %1527 = vmatpush3.bf16.msra.mxu1 %v1872_v13  ;;  %v1613_v13 = vld [vmem:[%s2238_s4 + $0x28] sm:$0xff]  }
 0x47e   : > { %1528 = vmatprep.subr.bf16.mxu1 %v1729_v9 }
 0x481   : > { %1529 = vmatpush3.bf16.msra.mxu1 %v1882_v14  ;;  %v1614_v14 = vld [vmem:[%s2238_s4 + $0x20] sm:$0xff]  }
 0x482   : > { %1530 = vmatprep.subr.bf16.mxu1 %v1729_v9 }
 0x485   : > { %1531 = vmatpush3.bf16.msra.mxu1 %v1891_v15  ;;  %v1615_v15 = vld [vmem:[%s2238_s4 + $0x18] sm:$0xff]  }
 0x486   : > { %1532 = vmatprep.subr.bf16.mxu1 %v1729_v9  ;;  %v1612_v9 = vld [vmem:[%s2238_s4 + $0x30] sm:$0xff]  }
 0x489   : > { %1533 = vmatpush3.bf16.msra.mxu1 %v1903_v16  ;;  %v1616_v16 = vld [vmem:[%s2238_s4 + $0x10] sm:$0xff]  }
 0x52c   : > { %v712_v3 = vpop.f32.mrf.mxu1 }
 0x52d   : > { %v718_v4 = vadd.f32 %v1276_v2, %v712_v3 }
 0x52e   : > { %v1496_v5 = vpop.f32.mrf.mxu1 }
 0x52f   : > { %v719_v6 = vadd.f32 %v1942_v20, %v718_v4 }
 0x530   : > { %v715_v7 = vpop.f32.mrf.mxu1 }
 0x531   : > { %1629 = vtanh.f32 %v719_v6 }
 0x532   : > { %v1497_v8 = vpop.f32.mrf.mxu1 }
 0x53e   : > { %v1630_v10 = vpop.eup %1629 }
 0x53f   : > { %v725_v11 = vpack.c.bf16 %v1630_v10, %v1630_v10  ;;  %v830_v21 = vpack.c.bf16 %v1630_v10, %v1628_v63 }
 0x541   : > { %1515 = vmatmul.mubr.bf16.vlgmr.msra.gmra.mxu0 %v725_v11 }
 0x542   : > { %1539 = vmatpush3.bf16.msra.mxu0 %v1611_v1  ;;  %1554 = vmatprep.mubr.bf16.mxu0 %v828_v12 }
 0x543   : > { %1540 = vmatprep.subr.bf16.mxu0 %v1612_v9 }
 0x546   : > { %1541 = vmatpush3.bf16.msra.mxu0 %v1612_v9 }
 0x547   : > { %1542 = vmatprep.subr.bf16.mxu0 %v1613_v13 }
 0x54a   : > { %1543 = vmatpush3.bf16.msra.mxu0 %v1613_v13 }
 0x54b   : > { %1544 = vmatprep.subr.bf16.mxu0 %v1614_v14 }
 0x54e   : > { %1545 = vmatpush3.bf16.msra.mxu0 %v1614_v14 }
 0x54f   : > { %1546 = vmatprep.subr.bf16.mxu0 %v1615_v15 }
 0x552   : > { %1547 = vmatpush3.bf16.msra.mxu0 %v1615_v15 }
 0x553   : > { %1548 = vmatprep.subr.bf16.mxu0 %v1616_v16 }
 0x556   : > { %1549 = vmatpush3.bf16.msra.mxu0 %v1616_v16 }
 0x557   : > { %1550 = vmatprep.subr.bf16.mxu0 %v1617_v17 }
 0x55a   : > { %1551 = vmatpush3.bf16.msra.mxu0 %v1617_v17 }
 0x55b   : > { %1552 = vmatprep.subr.bf16.mxu0 %v1618_v18 }
 0x55e   : > { %1553 = vmatpush3.bf16.msra.mxu0 %v1618_v18 }
 0x561   : > { %1555 = vmatmul.mubr.bf16.vlgmr.msra.gmra.mxu0 %v829_v19 }
 0x562   : > { %1558 = vmatprep.mubr.bf16.mxu0 %v830_v21 }
 0x601   : > { %v760_v23 = vpop.f32.mrf.mxu0 }
 0x602   : > { %v766_v24 = vadd.f32 %v1277_v22, %v760_v23 }
 0x603   : > { %v1516_v25 = vpop.f32.mrf.mxu0 }
 0x604   : > { %v767_v26 = vadd.f32 %v1942_v20, %v766_v24 }
 0x605   : > { %v763_v27 = vpop.f32.mrf.mxu0 }
 0x606   : > { %1631 = vtanh.f32 %v767_v26 }
 0x607   : > { %v1517_v28 = vpop.f32.mrf.mxu0 }
 0x613   : > { %v1632_v29 = vpop.eup %1631 }
 0x614   : > { %v773_v30 = vpack.c.bf16 %v1632_v29, %v1632_v29 }
 0x616   : > { %1535 = vmatmul.mubr.bf16.vlgmr.msra.gmra.mxu1 %v773_v30 }
 0x621   : > { %v1556_v32 = vpop.f32.mrf.mxu0 }
 0x622   : > { %v2092_v33 = vadd.f32 %v1556_v32, %v1279_v31 }
 0x623   : > { %v937_v34 = vpop.f32.mrf.mxu0 }
 0x624   : > { %v2094_v35 = vadd.f32 %v1279_v31, %v937_v34  ;;  %972 = vmax.xlane.f32.xlu1 %v2092_v33 }
 0x625   : > { %v1557_v36 = vpop.f32.mrf.mxu0 }
 0x626   : > { %v2097_v37 = vadd.f32 %v1557_v36, %v1279_v31  ;;  %968 = vmax.xlane.f32.xlu0 %v2094_v35 }
 0x627   : > { %v940_v38 = vpop.f32.mrf.mxu0 }
 0x628   : > { %v2100_v39 = vadd.f32 %v1279_v31, %v940_v38  ;;  %974 = vmax.xlane.f32.xlu1 %v2097_v37 }
 0x62a   : > { %970 = vmax.xlane.f32.xlu0 %v2100_v39 }
 0x6ad   : > { %v2112_v50 = vpop.xlane.xlu1 %972 }
 0x6af   : > { %v2110_v49 = vpop.xlane.xlu0 %968 }
 0x6b0   : > { %v984_v51 = vsub.f32 %v2094_v35, %v2110_v49 }
 0x6b1   : > { %v2122_v55 = vpop.xlane.xlu1 %974 }
 0x6b2   : > { %v992_v53 = vmul.f32 1.442695, %v984_v51  ;;  %v987_v57 = vsub.f32 %v2097_v37, %v2122_v55 }
 0x6b3   : > { %v2116_v52 = vpop.xlane.xlu0 %970 }
 0x6b4   : > { %v985_v54 = vsub.f32 %v2100_v39, %v2116_v52  ;;  %v998_v61 = vmul.f32 1.442695, %v987_v57 }
 0x6b6   : > { %v994_v58 = vmul.f32 1.442695, %v985_v54 }
 0x6d6   : > { %v808_v41 = vpop.f32.mrf.mxu1 }
 0x6d7   : > { %v814_v42 = vadd.f32 %v1278_v40, %v808_v41 }
 0x6d8   : > { %v1536_v43 = vpop.f32.mrf.mxu1 }
 0x6d9   : > { %v815_v44 = vadd.f32 %v1942_v20, %v814_v42  ;;  %v986_v20 = vsub.f32 %v2092_v33, %v2112_v50 }
 0x6da   : > { %v811_v45 = vpop.f32.mrf.mxu1 }
 0x6db   : > { %1633 = vtanh.f32 %v815_v44  ;;  %v996_v56 = vmul.f32 1.442695, %v986_v20 }
 0x6dc   : > { %v1537_v46 = vpop.f32.mrf.mxu1  ;;  %1635 = vpow2.f32 %v992_v53 }
 0x6dd   : > { %1637 = vpow2.f32 %v996_v56 }
 0x6de   : > { %1639 = vpow2.f32 %v994_v58 }
 0x6df   : > { %1641 = vpow2.f32 %v998_v61 }
 0x6e8   : > { %v1634_v47 = vpop.eup %1633 }
 0x6e9   : > { %819 = vst [vmem:[%s2107_s9] sm:$0xff] %v1634_v47  ;;  %v831_v48 = vpack.c.bf16 %v1634_v47, %v1632_v29  ;;  %v1636_v4 = vpop.eup %1635 }
 0x6ea   : > { %v1638_v5 = vpop.eup %1637 }
 0x6eb   : > { %1559 = vmatmul.mubr.bf16.gmra.mxu0 %v831_v48  ;;  %v1640_v6 = vpop.eup %1639 }
 0x6ec   : > { %v1642_v7 = vpop.eup %1641 }
 0x7ab   : > { %v1560_v59 = vpop.f32.mrf.mxu0 }
 0x7ac   : > { %v2129_v1 = vadd.f32 %v1560_v59, %v1279_v31 }
 0x7ad   : > { %v953_v60 = vpop.f32.mrf.mxu0 }
 0x7ae   : > { %v2126_v62 = vadd.f32 %v1279_v31, %v953_v60 }
 0x7af   : > { %v1561_v63 = vpop.f32.mrf.mxu0 }
 0x7b0   : > { %976 = vmax.xlane.f32.xlu0 %v2126_v62  ;;  %v2135_v3 = vadd.f32 %v1561_v63, %v1279_v31 }
 0x7b1   : > { %v956_v0 = vpop.f32.mrf.mxu0 }
 0x7b2   : > { %v2131_v2 = vadd.f32 %v1279_v31, %v956_v0 }
 0x7b4   : > { %978 = vmax.xlane.f32.xlu1 %v2131_v2  ;;  %980 = vmax.xlane.f32.xlu0 %v2129_v1 }
 0x7b8   : > { %982 = vmax.xlane.f32.xlu1 %v2135_v3  ;;  %1008 = vadd.xlane.f32.xlu0 %v1636_v4 }
 0x7bc   : > { %1010 = vadd.xlane.f32.xlu1 %v1640_v6  ;;  %1012 = vadd.xlane.f32.xlu0 %v1638_v5 }
 0x7c0   : > { %1014 = vadd.xlane.f32.xlu1 %v1642_v7 }
 0x839   : > { %v2138_v8 = vpop.xlane.xlu0 %976 }
 0x83a   : > { %v988_v10 = vsub.f32 %v2126_v62, %v2138_v8 }
 0x83c   : > { %v1000_v11 = vmul.f32 1.442695, %v988_v10 }
 0x83d   : > { %v2142_v9 = vpop.xlane.xlu1 %978  ;;  %v2144_v12 = vpop.xlane.xlu0 %980 }
 0x83e   : > { %1643 = vpow2.f32 %v1000_v11  ;;  %v989_v13 = vsub.f32 %v2131_v2, %v2142_v9  ;;  %v990_v14 = vsub.f32 %v2129_v1, %v2144_v12 }
 0x840   : > { %v1002_v15 = vmul.f32 1.442695, %v989_v13  ;;  %v1004_v16 = vmul.f32 1.442695, %v990_v14 }
 0x841   : > { %v2150_v17 = vpop.xlane.xlu1 %982  ;;  %v1009_v18 = vpop.xlane.xlu0 %1008 }
 0x842   : > { %1645 = vpow2.f32 %v1002_v15  ;;  %v991_v19 = vsub.f32 %v2135_v3, %v2150_v17 }
 0x843   : > { %1647 = vpow2.f32 %v1004_v16 }
 0x844   : > { %v1006_v21 = vmul.f32 1.442695, %v991_v19  ;;  %1649 = vlog2.f32 %v1009_v18 }
 0x845   : > { %v1011_v22 = vpop.xlane.xlu1 %1010  ;;  %v1013_v23 = vpop.xlane.xlu0 %1012 }
 0x846   : > { %1651 = vpow2.f32 %v1006_v21 }
 0x847   : > { %1653 = vlog2.f32 %v1011_v22 }
 0x848   : > { %1655 = vlog2.f32 %v1013_v23 }
 0x849   : > { %v1015_v24 = vpop.xlane.xlu1 %1014 }
 0x84a   : > { %1657 = vlog2.f32 %v1015_v24 }
 0x84b   : > { %v1644_v25 = vpop.eup %1643 }
 0x84c   : > { %1016 = vadd.xlane.f32.xlu0 %v1644_v25 }
 0x84f   : > { %v1646_v26 = vpop.eup %1645 }
 0x850   : > { %v1648_v27 = vpop.eup %1647  ;;  %1018 = vadd.xlane.f32.xlu1 %v1646_v26 }
 0x851   : > { %v1650_v28 = vpop.eup %1649  ;;  %1020 = vadd.xlane.f32.xlu0 %v1648_v27 }
 0x852   : > { %v1025_v29 = vmul.f32 0.6931472, %v1650_v28 }
 0x853   : > { %v1652_v30 = vpop.eup %1651 }
 0x854   : > { %v1654_v31 = vpop.eup %1653  ;;  %v1040_v32 = vadd.f32 %v1025_v29, %v2110_v49  ;;  %1022 = vadd.xlane.f32.xlu1 %v1652_v30 }
 0x855   : > { %v1656_v34 = vpop.eup %1655  ;;  %v1027_v36 = vmul.f32 0.6931472, %v1654_v31 }
 0x856   : > { %v1048_v38 = vsub.f32 %v2094_v35, %v1040_v32  ;;  %v1029_v40 = vmul.f32 0.6931472, %v1656_v34 }
 0x857   : > { %v1658_v41 = vpop.eup %1657  ;;  %v1041_v42 = vadd.f32 %v1027_v36, %v2116_v52 }
 0x858   : > { %1056 = vst [vmem:[%s2159_s15] sm:$0xff] %v1048_v38  ;;  %v1042_v43 = vadd.f32 %v1029_v40, %v2112_v50  ;;  %v1031_v44 = vmul.f32 0.6931472, %v1658_v41 }
 0x859   : > { %v1049_v45 = vsub.f32 %v2100_v39, %v1041_v42 }
 0x85a   : > { %v1050_v46 = vsub.f32 %v2092_v33, %v1042_v43  ;;  %v1043_v35 = vadd.f32 %v1031_v44, %v2122_v55 }
 0x85b   : > { %1057 = vst [vmem:[%s2159_s15 + $0x8] sm:$0xff] %v1049_v45 }
 0x85c   : > { %1058 = vst [vmem:[%s2159_s15 + $0x10] sm:$0xff] %v1050_v46  ;;  %v1051_v47 = vsub.f32 %v2097_v37, %v1043_v35 }
 0x85e   : > { %1059 = vst [vmem:[%s2159_s15 + $0x18] sm:$0xff] %v1051_v47 }
 0x8d5   : > { %v1017_v48 = vpop.xlane.xlu0 %1016 }
 0x8d6   : > { %1659 = vlog2.f32 %v1017_v48 }
 0x8d9   : > { %v1019_v49 = vpop.xlane.xlu1 %1018 }
 0x8da   : > { %1661 = vlog2.f32 %v1019_v49  ;;  %v1021_v51 = vpop.xlane.xlu0 %1020 }
 0x8db   : > { %1663 = vlog2.f32 %v1021_v51 }
 0x8dd   : > { %v1023_v50 = vpop.xlane.xlu1 %1022 }
 0x8de   : > { %1665 = vlog2.f32 %v1023_v50 }
 0x8e3   : > { %v1660_v39 = vpop.eup %1659 }
 0x8e4   : > { %v1033_v52 = vmul.f32 0.6931472, %v1660_v39 }
 0x8e6   : > { %v1044_v33 = vadd.f32 %v1033_v52, %v2138_v8 }
 0x8e7   : > { %v1662_v20 = vpop.eup %1661 }
 0x8e8   : > { %v1664_v53 = vpop.eup %1663  ;;  %v1052_v37 = vsub.f32 %v2126_v62, %v1044_v33  ;;  %v1035_v54 = vmul.f32 0.6931472, %v1662_v20  ;;  %v1120_v62 = vld [vmem:[%s2159_s15] sm:$0xff] (%p1811_p6) }
 0x8e9   : > { %v1037_v55 = vmul.f32 0.6931472, %v1664_v53  ;;  %1121 = vst [vmem:[%s1077_s19] sm:$0xff] (%p1811_p6), %v1120_v62 }
 0x8ea   : > { %1060 = vst [vmem:[%s2159_s15 + $0x20] sm:$0xff] %v1052_v37  ;;  %v1045_v56 = vadd.f32 %v1035_v54, %v2142_v9 }
 0x8eb   : > { %v1666_v57 = vpop.eup %1665  ;;  %v1046_v58 = vadd.f32 %v1037_v55, %v2144_v12 }
 0x8ec   : > { %v1053_v59 = vsub.f32 %v2131_v2, %v1045_v56  ;;  %v1039_v60 = vmul.f32 0.6931472, %v1666_v57  ;;  %v1124_v2 = vld [vmem:[%s2159_s15 + $0x10] sm:$0xff] (%p1811_p6) }
 0x8ed   : > { %v1054_v61 = vsub.f32 %v2129_v1, %v1046_v58  ;;  %v1122_v1 = vld [vmem:[%s2159_s15 + $0x8] sm:$0xff] (%p1811_p6)  ;;  %1125 = vst [vmem:[%s1077_s19 + $0x20] sm:$0xff] (%p1811_p6), %v1124_v2 }
 0x8ee   : > { %1061 = vst [vmem:[%s2159_s15 + $0x28] sm:$0xff] %v1053_v59  ;;  %v1047_v63 = vadd.f32 %v1039_v60, %v2150_v17  ;;  %1075 = sbr.rel (!%p1811_p6) target bundleno = 2299 (0x8fb), region = 86  ;;  %1123 = vst [vmem:[%s1077_s19 + $0x10] sm:$0xff] (%p1811_p6), %v1122_v1 }
 0x8ef   : > { %1062 = vst [vmem:[%s2159_s15 + $0x30] sm:$0xff] %v1054_v61 }
 0x8f0   : > { %v1055_v0 = vsub.f32 %v2135_v3, %v1047_v63  ;;  %v1126_v3 = vld [vmem:[%s2159_s15 + $0x18] sm:$0xff] (%p1811_p6) }
 0x8f1   : > { %v1128_v4 = vld [vmem:[%s2159_s15 + $0x20] sm:$0xff] (%p1811_p6)  ;;  %1127 = vst [vmem:[%s1077_s19 + $0x30] sm:$0xff] (%p1811_p6), %v1126_v3 }
 0x8f2   : > { %1063 = vst [vmem:[%s2159_s15 + $0x38] sm:$0xff] %v1055_v0  ;;  %1129 = vst [vmem:[%s1077_s19 + $0x40] sm:$0xff] (%p1811_p6), %v1128_v4 }
 0x8f5   : > { %v1130_v5 = vld [vmem:[%s2159_s15 + $0x28] sm:$0xff] }
 0x8f6   : > { %1131 = vst [vmem:[%s1077_s19 + $0x50] sm:$0xff] %v1130_v5  ;;  %v1132_v6 = vld [vmem:[%s2159_s15 + $0x30] sm:$0xff] }
 0x8f7   : > { %1133 = vst [vmem:[%s1077_s19 + $0x60] sm:$0xff] %v1132_v6 }
 0x8f9   : > { %v1134_v7 = vld [vmem:[%s2159_s15 + $0x38] sm:$0xff] }
 0x8fa   : > { %1135 = vst [vmem:[%s1077_s19 + $0x70] sm:$0xff] %v1134_v7 }
 0x8fb PF: > { %s1291_s20 = sshll.u32 %s1793_s28, 7  ;;  %s1148_s21 = sshll.u32 %s2107_s9, 4  ;;  %s1149_s21 = int_to_ptr.vmem [resolvable:$true] %s1148_s21 }
 0x8fc   : > { %s1146_s29 = scalar_lea.hbm %s2241_s7, %s1291_s20  ;;  %s1667_s8 = scalar_lea.vmem %s1149_s21, 128 }
 0x8fd   : > { %p1668_p0 = scmp.ne.s32.totalorder %s1149_s21, %s1667_s8  ;;  %s1731_s16 = smov [#allocation5]  }
 0x8fe   : > { %s1671_s15 = sshll.u32 %s1731_s16, 4  ;;  %s1672_s15 = int_to_ptr.vmem [resolvable:$false] %s1671_s15 }
 0x8ff   : > { %p1669_p1 = pnand %p1668_p0, %p1811_p6  ;;  %s1673_s17 = scalar_lea.vmem %s1672_s15, 256 }
 0x900   : > { %p1674_p3 = scmp.lt.s32.totalorder %s1149_s21, %s1672_s15  ;;  %p1675_p4 = scmp.lt.s32.totalorder %s1673_s17, %s1667_s8 }
 0x901   : > { %p1670_p2 = pneg %p1669_p1 }
 0x902   : > { %p1676_p5 = por %p1675_p4, %p1674_p3 }
 0x904   : > { %p1677_p7 = pnand %p1676_p5, %p1670_p2 }
 0x906   : > { %1680 = shalt.err (!%p1677_p7)
}
 0x907   : > { %s1681_s28 = scalar_lea.hbm %s1146_s29, 128  ;;  %s1685_s19 = scalar_lea.hbm %s2241_s7, 256 }
 0x908   : > { %p1682_p10 = scmp.ne.s32.totalorder %s1146_s29, %s1681_s28  ;;  %p1686_p13 = scmp.lt.s32.totalorder %s1146_s29, %s2241_s7 }
 0x909   : > { %p1687_p0 = scmp.lt.s32.totalorder %s1685_s19, %s1681_s28 }
 0x90a   : > { %p1683_p11 = pnand %p1682_p10, %p1811_p6 }
 0x90b   : > { %p1688_p1 = por %p1687_p0, %p1686_p13 }
 0x90c   : > { %p1684_p12 = pneg %p1683_p11 }
 0x90e   : > { %p1689_p9 = pnand %p1688_p1, %p1684_p12 }
 0x910   : > { %1692 = shalt.err (!%p1689_p9)
}
 0x911   : > { %1562 = dma.vmem_to_hbm [thread:$0]  (%p1811_p6), %s1149_s21, 128, %s1146_s29, %s1069_s14  }
 0x912 PF: > { %s1167_s23 = sand.u32 1, %s1715_s24   ;;  %p2245_p2 = scmp.ge.s32.totalorder %s1727_s27, 2 }
 0x913   : > { %s1168_s8 = scalar_lea.sflag [#allocation6], %s1167_s23 }
 0x914   : > { %p1565_p3 = pnand %p2245_p2, %p1815_p8 }
 0x916   : > { %p1566_p4 = pneg %p1565_p3 }
 0x918   : > { %1710 = dma.done.wait (%p1566_p4), %s1168_s8, 128  }
 0x919   : > { %1712 = vsyncadd (%p1566_p4), %s1168_s8, 4294967168  ;;  %p18_p9 = scmp.ge.s32.totalorder %s1797_s30, 4   ;;  %s2246_s24 = smov %s1719_s25 }
 0x91a   : > { %s2247_s25 = smov %s1723_s26  ;;  %s2248_s26 = smov %s1809_s10 }
 0x91b   : > { %s2249_s27 = smov %s1797_s30  ;;  %20 = sbr.rel (!%p18_p9) target bundleno = 3 (0x3), region = 189 }
 0x920   :  { %1173 = vsyncpa [#allocation6], 1 }
 0x921   :  { %1175 = vsyncpa [#allocation6 + $0x1], 1 }

</bundles_post_ra>
